<compile_context>
chip_gen: v7x
topology: tpu7x:2x2x1
jax: 0.10.0
libtpu: 0.0.40
codegen_flags: <defaults>
</compile_context>

<pallas_src>
import math

import jax
import jax.numpy as jnp
from jax.experimental import pallas as pl
from jax.experimental.pallas import tpu as pltpu


def _mlp_kernel(x_ref, w1_ref, b1_ref, w2_ref, b2_ref, w3_ref, b3_ref, o_ref):
    """Fused 3-layer MLP + final ReLU on one batch tile (native row-major).

    x_ref : (bt, input_dim)     io_dtype
    w1_ref: (input_dim, 32)     io_dtype    b1_ref: (1, 32)          f32
    w2_ref: (32, 16)            io_dtype    b2_ref: (1, 16)          f32
    w3_ref: (16, output_dim)    io_dtype    b3_ref: (1, output_dim)  f32
    o_ref : (bt, output_dim)    io_dtype
    """
    w_dtype = w1_ref.dtype

    h = jnp.dot(x_ref[...], w1_ref[...], preferred_element_type=jnp.float32)
    h = jnp.maximum(h + b1_ref[...], 0.0)

    h = jnp.dot(h.astype(w_dtype), w2_ref[...], preferred_element_type=jnp.float32)
    h = jnp.maximum(h + b2_ref[...], 0.0)

    h = jnp.dot(h.astype(w_dtype), w3_ref[...], preferred_element_type=jnp.float32)
    o_ref[...] = jnp.maximum(h + b3_ref[...], 0.0).astype(o_ref.dtype)


def _pick_batch_tile(batch, requested, target=2048):
    """Batch tile: a multiple of 8 (sublane axis) that divides batch."""
    if requested is not None:
        if requested == batch or (requested % 8 == 0 and batch % requested == 0):
            return requested
        raise ValueError(
            f"batch_tile={requested} must equal batch ({batch}) or be a "
            f"multiple of 8 that divides batch")
    if batch <= target:
        return batch
    tile = target - (target % 8)
    while tile >= 8 and batch % tile != 0:
        tile -= 8
    return tile if (tile >= 8 and batch % tile == 0) else batch


def autoencoder1d_forward(x, params, *, batch_tile=None, io_dtype=None):
    """Fused Autoencoder1D forward: relu(L3(relu(L2(relu(L1(x)))))).

    x        : (B, input_dim)
    params   : torch-layout weights  w{i}: (out_i, in_i),  b{i}: (out_i,)
    io_dtype : dtype streamed through HBM for x / weights / output
               (f32 or bf16; accumulation is always f32).
    """
    B, in_dim = x.shape
    h1, h2 = params["w1"].shape[0], params["w2"].shape[0]
    out_dim = params["w3"].shape[0]
    assert params["w1"].shape == (h1, in_dim)
    assert params["w2"].shape == (h2, h1)
    assert params["w3"].shape == (out_dim, h2)

    io_dtype = jnp.dtype(x.dtype if io_dtype is None else io_dtype)
    tile = _pick_batch_tile(B, batch_tile)
    grid = (B // tile,)

    # TODO(synk): if io_dtype != x.dtype this cast is one extra XLA pass over x;
    # ideally the producer already supplies x in io_dtype.
    x_io = x if x.dtype == io_dtype else jnp.asarray(x, io_dtype)

    # Tiny, one-off weight re-layout to (in, out); biases as (1, out) f32 rows.
    w1 = jnp.asarray(params["w1"], io_dtype).T          # (in_dim, h1)
    w2 = jnp.asarray(params["w2"], io_dtype).T          # (h1, h2)
    w3 = jnp.asarray(params["w3"], io_dtype).T          # (h2, out_dim)
    b1 = jnp.asarray(params["b1"], jnp.float32).reshape(1, h1)
    b2 = jnp.asarray(params["b2"], jnp.float32).reshape(1, h2)
    b3 = jnp.asarray(params["b3"], jnp.float32).reshape(1, out_dim)

    batch_map = lambda i: (i, 0)     # tile the batch (sublane) axis
    const_map = lambda i: (0, 0)     # weights/biases: VMEM resident

    # Explicit scoped-VMEM budget (defaults: 16/32/32 MiB on v5e/v6e/v7x).
    itemsize = io_dtype.itemsize
    lane = lambda n: -(-n // 128) * 128                           # lane padding
    need = (2 * tile * lane(in_dim) * itemsize                    # x buffers
            + 2 * tile * lane(out_dim) * itemsize                 # out buffers
            + 3 * tile * lane(max(h1, h2, out_dim)) * 4           # f32 temps
            + (1 << 20))                                          # weights+slack
    vmem_limit = int(min(48 * 2**20, max(16 * 2**20, 2 * need)))

    out = pl.pallas_call(
        _mlp_kernel,
        out_shape=jax.ShapeDtypeStruct((B, out_dim), io_dtype),
        grid=grid,
        in_specs=[
            pl.BlockSpec((tile, in_dim), batch_map),               # x tile
            pl.BlockSpec((in_dim, h1), const_map),                 # w1
            pl.BlockSpec((1, h1), const_map),                      # b1
            pl.BlockSpec((h1, h2), const_map),                     # w2
            pl.BlockSpec((1, h2), const_map),                      # b2
            pl.BlockSpec((h2, out_dim), const_map),                # w3
            pl.BlockSpec((1, out_dim), const_map),                 # b3
        ],
        out_specs=pl.BlockSpec((tile, out_dim), batch_map),
        compiler_params=pltpu.CompilerParams(
            dimension_semantics=("parallel",),
            vmem_limit_bytes=vmem_limit,
        ),
    )(x_io, w1, b1, w2, b2, w3, b3)

    return out


def init_params(key, input_dim, output_dim):
    """torch.nn.Linear-style init; weights kept in native torch (out, in) layout."""
    dims = [(input_dim, 32), (32, 16), (16, output_dim)]
    params = {}
    for idx, (fan_in, fan_out) in enumerate(dims, start=1):
        key, kw, kb = jax.random.split(key, 3)
        bound = 1.0 / math.sqrt(fan_in)
        params[f"w{idx}"] = jax.random.uniform(
            kw, (fan_out, fan_in), jnp.float32, minval=-bound, maxval=bound)
        params[f"b{idx}"] = jax.random.uniform(
            kb, (fan_out,), jnp.float32, minval=-bound, maxval=bound)
    return params


def reference_forward(x, params):
    h = jnp.maximum(x @ params["w1"].T + params["b1"], 0.0)
    h = jnp.maximum(h @ params["w2"].T + params["b2"], 0.0)
    h = h @ params["w3"].T + params["b3"]
    return jnp.maximum(h, 0.0)


if __name__ == "__main__":
    key = jax.random.PRNGKey(0)
    kx, kp = jax.random.split(key)

    batch, input_dim, output_dim = 512, 64, 8
    x = jax.random.normal(kx, (batch, input_dim), jnp.float32)
    params = init_params(kp, input_dim, output_dim)

    ref = reference_forward(x, params)

    # f32 I/O: 4 batch tiles of 128 rows -> grid=(4,), pipelined DMA.
    out = jax.block_until_ready(autoencoder1d_forward(x, params, batch_tile=128))
    assert out.shape == (batch, output_dim)
    assert out.dtype == x.dtype
    assert jnp.allclose(out, ref, atol=1e-4, rtol=1e-4), "f32 kernel mismatch"

    # Auto-tiled path (single tile here since batch <= target).
    out_auto = jax.block_until_ready(autoencoder1d_forward(x, params))
    assert jnp.allclose(out_auto, ref, atol=1e-4, rtol=1e-4), "auto-tile mismatch"

    # bf16 I/O (halves HBM traffic; accumulation stays f32).
    out_bf16 = jax.block_until_ready(
        autoencoder1d_forward(x, params, batch_tile=128, io_dtype=jnp.bfloat16))
    assert out_bf16.dtype == jnp.bfloat16
    assert jnp.allclose(out_bf16.astype(jnp.float32), ref, atol=1e-1, rtol=1e-1), \
        "bf16 kernel mismatch"

    print("KERNEL_OK")
</pallas_src>

<mosaic_0001>
module attributes {stable_mosaic.version = 11 : i64} {
  func.func @_mlp_kernel(%arg0: i32, %arg1: memref<128x64xf32, #tpu.memory_space<vmem>>, %arg2: memref<64x32xf32, #tpu.memory_space<vmem>>, %arg3: memref<1x32xf32, #tpu.memory_space<vmem>>, %arg4: memref<32x16xf32, #tpu.memory_space<vmem>>, %arg5: memref<1x16xf32, #tpu.memory_space<vmem>>, %arg6: memref<16x8xf32, #tpu.memory_space<vmem>>, %arg7: memref<1x8xf32, #tpu.memory_space<vmem>>, %arg8: memref<128x8xf32, #tpu.memory_space<vmem>>) attributes {dimension_semantics = [#tpu.dimension_semantics<parallel>], iteration_bounds = array<i64: 4>, scalar_prefetch = 0 : i64, scratch_operands = 0 : i64, tpu.core_type = #tpu.core_type<tc>, window_params = [{transform_indices = @transform_0, window_bounds = array<i64: 128, 64>}, {pipeline_mode = #tpu.pipeline_mode<synchronous>, transform_indices = @transform_1, window_bounds = array<i64: 64, 32>}, {pipeline_mode = #tpu.pipeline_mode<synchronous>, transform_indices = @transform_2, window_bounds = array<i64: 1, 32>}, {pipeline_mode = #tpu.pipeline_mode<synchronous>, transform_indices = @transform_3, window_bounds = array<i64: 32, 16>}, {pipeline_mode = #tpu.pipeline_mode<synchronous>, transform_indices = @transform_4, window_bounds = array<i64: 1, 16>}, {pipeline_mode = #tpu.pipeline_mode<synchronous>, transform_indices = @transform_5, window_bounds = array<i64: 16, 8>}, {pipeline_mode = #tpu.pipeline_mode<synchronous>, transform_indices = @transform_6, window_bounds = array<i64: 1, 8>}, {transform_indices = @transform_7, window_bounds = array<i64: 128, 8>}]} {
    %c0 = arith.constant 0 : index
    %c0_0 = arith.constant 0 : index
    %0 = vector.load %arg1[%c0, %c0_0] : memref<128x64xf32, #tpu.memory_space<vmem>>, vector<128x64xf32>
    %c0_1 = arith.constant 0 : index
    %c0_2 = arith.constant 0 : index
    %1 = vector.load %arg2[%c0_1, %c0_2] : memref<64x32xf32, #tpu.memory_space<vmem>>, vector<64x32xf32>
    %cst = arith.constant dense<0.000000e+00> : vector<128x32xf32>
    %2 = tpu.matmul %0, %1, %cst {dimension_numbers = #tpu.dot_dimension_numbers<[1], [0], [0], [1], [0, 0, 1, 1], [], []>} : vector<128x64xf32>, vector<64x32xf32>, vector<128x32xf32> -> vector<128x32xf32>
    %c0_3 = arith.constant 0 : index
    %c0_4 = arith.constant 0 : index
    %3 = vector.load %arg3[%c0_3, %c0_4] : memref<1x32xf32, #tpu.memory_space<vmem>>, vector<1x32xf32>
    %4 = vector.broadcast %3 : vector<1x32xf32> to vector<128x32xf32>
    %5 = arith.addf %2, %4 : vector<128x32xf32>
    %cst_5 = arith.constant 0.000000e+00 : f32
    %6 = vector.broadcast %cst_5 : f32 to vector<128x32xf32>
    %7 = arith.maximumf %5, %6 : vector<128x32xf32>
    %c0_6 = arith.constant 0 : index
    %c0_7 = arith.constant 0 : index
    %8 = vector.load %arg4[%c0_6, %c0_7] : memref<32x16xf32, #tpu.memory_space<vmem>>, vector<32x16xf32>
    %cst_8 = arith.constant dense<0.000000e+00> : vector<128x16xf32>
    %9 = tpu.matmul %7, %8, %cst_8 {dimension_numbers = #tpu.dot_dimension_numbers<[1], [0], [0], [1], [0, 0, 1, 1], [], []>} : vector<128x32xf32>, vector<32x16xf32>, vector<128x16xf32> -> vector<128x16xf32>
    %c0_9 = arith.constant 0 : index
    %c0_10 = arith.constant 0 : index
    %10 = vector.load %arg5[%c0_9, %c0_10] : memref<1x16xf32, #tpu.memory_space<vmem>>, vector<1x16xf32>
    %11 = vector.broadcast %10 : vector<1x16xf32> to vector<128x16xf32>
    %12 = arith.addf %9, %11 : vector<128x16xf32>
    %cst_11 = arith.constant 0.000000e+00 : f32
    %13 = vector.broadcast %cst_11 : f32 to vector<128x16xf32>
    %14 = arith.maximumf %12, %13 : vector<128x16xf32>
    %c0_12 = arith.constant 0 : index
    %c0_13 = arith.constant 0 : index
    %15 = vector.load %arg6[%c0_12, %c0_13] : memref<16x8xf32, #tpu.memory_space<vmem>>, vector<16x8xf32>
    %cst_14 = arith.constant dense<0.000000e+00> : vector<128x8xf32>
    %16 = tpu.matmul %14, %15, %cst_14 {dimension_numbers = #tpu.dot_dimension_numbers<[1], [0], [0], [1], [0, 0, 1, 1], [], []>} : vector<128x16xf32>, vector<16x8xf32>, vector<128x8xf32> -> vector<128x8xf32>
    %c0_15 = arith.constant 0 : index
    %c0_16 = arith.constant 0 : index
    %17 = vector.load %arg7[%c0_15, %c0_16] : memref<1x8xf32, #tpu.memory_space<vmem>>, vector<1x8xf32>
    %18 = vector.broadcast %17 : vector<1x8xf32> to vector<128x8xf32>
    %19 = arith.addf %16, %18 : vector<128x8xf32>
    %cst_17 = arith.constant 0.000000e+00 : f32
    %20 = vector.broadcast %cst_17 : f32 to vector<128x8xf32>
    %21 = arith.maximumf %19, %20 : vector<128x8xf32>
    %c0_18 = arith.constant 0 : index
    %c0_19 = arith.constant 0 : index
    %22 = vector.load %arg8[%c0_18, %c0_19] : memref<128x8xf32, #tpu.memory_space<vmem>>, vector<128x8xf32>
    tpu.vector_store %arg8[%c0_18, %c0_19], %21 {strides = array<i32>} : memref<128x8xf32, #tpu.memory_space<vmem>>, vector<128x8xf32>,
    return
  }
  func.func @transform_0(%arg0: i32) -> (i32, i32) {
    %c0_i32 = arith.constant 0 : i32
    %c0_i32_0 = arith.constant 0 : i32
    return %arg0, %c0_i32 : i32, i32
  }
  func.func @transform_1(%arg0: i32) -> (i32, i32) {
    %c0_i32 = arith.constant 0 : i32
    %c0_i32_0 = arith.constant 0 : i32
    %c0_i32_1 = arith.constant 0 : i32
    return %c0_i32, %c0_i32_0 : i32, i32
  }
  func.func @transform_2(%arg0: i32) -> (i32, i32) {
    %c0_i32 = arith.constant 0 : i32
    %c0_i32_0 = arith.constant 0 : i32
    %c0_i32_1 = arith.constant 0 : i32
    return %c0_i32, %c0_i32_0 : i32, i32
  }
  func.func @transform_3(%arg0: i32) -> (i32, i32) {
    %c0_i32 = arith.constant 0 : i32
    %c0_i32_0 = arith.constant 0 : i32
    %c0_i32_1 = arith.constant 0 : i32
    return %c0_i32, %c0_i32_0 : i32, i32
  }
  func.func @transform_4(%arg0: i32) -> (i32, i32) {
    %c0_i32 = arith.constant 0 : i32
    %c0_i32_0 = arith.constant 0 : i32
    %c0_i32_1 = arith.constant 0 : i32
    return %c0_i32, %c0_i32_0 : i32, i32
  }
  func.func @transform_5(%arg0: i32) -> (i32, i32) {
    %c0_i32 = arith.constant 0 : i32
    %c0_i32_0 = arith.constant 0 : i32
    %c0_i32_1 = arith.constant 0 : i32
    return %c0_i32, %c0_i32_0 : i32, i32
  }
  func.func @transform_6(%arg0: i32) -> (i32, i32) {
    %c0_i32 = arith.constant 0 : i32
    %c0_i32_0 = arith.constant 0 : i32
    %c0_i32_1 = arith.constant 0 : i32
    return %c0_i32, %c0_i32_0 : i32, i32
  }
  func.func @transform_7(%arg0: i32) -> (i32, i32) {
    %c0_i32 = arith.constant 0 : i32
    %c0_i32_0 = arith.constant 0 : i32
    return %arg0, %c0_i32 : i32, i32
  }
}

</mosaic_0001>

<bundles_post_ra>
// kernel: tpu_custom_call.1
= control target key start
LH: loop header
LB: loop body
LE: loop exit
PB: predicated region body
PF: predicated region fallthrough
CT: control target
= control target key end

     0   :  { %s1348_s24 = smov 0   ;;  %s1523_s0 = inlined_call_operand.vmem [shape: f32[512,64], index: 0, kind: input, shape index: {}]   ;;  %s1524_s1 = inlined_call_operand.vmem [shape: f32[64,32], index: 1, kind: input, shape index: {}]   ;;  %s1525_s2 = inlined_call_operand.vmem [shape: f32[1,32], index: 2, kind: input, shape index: {}]   ;;  %s1526_s3 = inlined_call_operand.vmem [shape: f32[32,16], index: 3, kind: input, shape index: {}]   ;;  %s1527_s4 = inlined_call_operand.vmem [shape: f32[1,16], index: 4, kind: input, shape index: {}]   ;;  %s1528_s5 = inlined_call_operand.vmem [shape: f32[16,8], index: 5, kind: input, shape index: {}]   ;;  %s1529_s6 = inlined_call_operand.vmem [shape: f32[1,8], index: 6, kind: input, shape index: {}]   ;;  %s1530_s7 = inlined_call_operand.vmem [shape: f32[512,8], index: 7, kind: output, shape index: {}]  }
   0x1 LB: > { %s1036_s25 = sadd.s32 4294967295, %s1306_s24   ;;  %p1040_p0 = scmp.ge.s32.totalorder %s1306_s24, 1  ;;  %s1306_s24 = sphi %s1348_s24, %s17_s24  }
   0x2   : > { %p238_p1 = scmp.lt.s32.totalorder %s1306_s24, 5 }
   0x4   : > { %p239_p2 = pnand %p1040_p0, %p238_p1 }
   0x5   : > { %v298_v0 = vld [vmem:[%s1524_s1] sm:$0xff] (!%p239_p2)  ;;  %v299_v1 = vld [vmem:[%s1524_s1 + $0x8] sm:$0xff] (!%p239_p2)  ;;  %v300_v2 = vld [vmem:[%s1524_s1 + $0x10] sm:$0xff] (!%p239_p2)  ;;  %s1041_s9 = sshll.u32 (!%p239_p2), %s1036_s25, 4  ;;  %vm313_vm0 = vcmask (!%p239_p2), 523264   ;;  %vm534_vm1 = vcmask (!%p239_p2), 261120  }
   0x6   : > { %242 = sbr.rel (%p239_p2) target bundleno = 706 (0x2c2), region = 48  ;;  %v1260_v3 = vpack.c.bf16 (!%p239_p2), %v299_v1, %v298_v0  ;;  %v301_v4 = vld [vmem:[%s1524_s1 + $0x18] sm:$0xff] (!%p239_p2)  ;;  %p271_p3 = scmp.lt.s32.totalorder (!%p239_p2), %s1041_s9, 63  ;;  %v302_v6 = vld [vmem:[%s1524_s1 + $0x20] sm:$0xff] (!%p239_p2)  ;;  %v303_v7 = vld [vmem:[%s1524_s1 + $0x28] sm:$0xff] (!%p239_p2)  ;;  %vm753_vm2 = vcmask (!%p239_p2), 130048  }
   0x7   : > { %v1264_v5 = vpack.c.bf16 (!%p239_p2), %v301_v4, %v300_v2  ;;  %v523_v8 = vld [vmem:[%s1526_s3] sm:$0xff] (!%p239_p2)  ;;  %v524_v9 = vld [vmem:[%s1526_s3 + $0x8] sm:$0xff] (!%p239_p2)  ;;  %v525_v11 = vld [vmem:[%s1526_s3 + $0x10] sm:$0xff] (!%p239_p2)  ;;  %v1268_v13 = vpack.c.bf16 (!%p239_p2), %v303_v7, %v302_v6  ;;  %vm963_vm3 = vcmask (!%p239_p2), 64512  }
   0x8   : > { %1261 = vmatprep.subr.bf16.mxu0 (!%p239_p2), %v1260_v3  ;;  %v1276_v10 = vpack.c.bf16 (!%p239_p2), %v524_v9, %v523_v8  ;;  %v526_v12 = vld [vmem:[%s1526_s3 + $0x18] sm:$0xff] (!%p239_p2)  ;;  %v304_v14 = vld [vmem:[%s1524_s1 + $0x30] sm:$0xff] (!%p239_p2)  ;;  %v744_v34 = vld [vmem:[%s1528_s5] sm:$0xff] (!%p239_p2) }
   0x9   : > { %1263 = vmatpush3.bf16.msra.mxu0 (!%p239_p2), %v1260_v3  ;;  %v305_v15 = vld [vmem:[%s1524_s1 + $0x38] sm:$0xff] (!%p239_p2)  ;;  %v1280_v17 = vpack.c.bf16 (!%p239_p2), %v526_v12, %v525_v11  ;;  %v745_v35 = vld [vmem:[%s1528_s5 + $0x8] sm:$0xff] (!%p239_p2)  ;;  %v1045_v37 = vld [vmem:[%s1525_s2] ss:$0 sm:$0xff] (!%p239_p2) }
   0xa   : > { %1265 = vmatprep.subr.bf16.mxu0 (!%p239_p2), %v1264_v5  ;;  %1288 = vmatprep.subr.bf16.mxu1 (!%p239_p2), %v1276_v10  ;;  %v1272_v18 = vpack.c.bf16 (!%p239_p2), %v305_v15, %v304_v14  ;;  %v1284_v36 = vpack.c.bf16 (!%p239_p2), %v745_v35, %v744_v34 }
   0xb   : > { %1290 = vmatpush3.bf16.msra.mxu1 (!%p239_p2), %v1276_v10 }
   0xc   : > { %1289 = vmatprep.subr.bf16.mxu1 (!%p239_p2), %v1280_v17 }
   0xd   : > { %s1532_s9 = smov (!%p271_p3, %s1041_s9), 63  ;;  %1267 = vmatpush3.bf16.msra.mxu0 %v1264_v5 }
   0xe   : > { %s1042_s25 = sshll.u32 %s1532_s9, 3  ;;  %1269 = vmatprep.subr.bf16.mxu0 %v1268_v13 }
   0xf   : > { %s1400_s10 = scalar_lea.vmem %s1523_s0, %s1042_s25  ;;  %1291 = vmatpush3.bf16.msra.mxu1 %v1280_v17  ;;  %s1486_s23 = scalar_lea.vmem %s1530_s7, %s1042_s25 }
  0x10   : > { %v282_v16 = vld [vmem:[%s1400_s10] sm:$0xff]  ;;  %v283_v19 = vld [vmem:[%s1400_s10 + $0x8] sm:$0xff]  ;;  %v284_v20 = vld [vmem:[%s1400_s10 + $0x10] sm:$0xff]  ;;  %1285 = vmatprep.subr.bf16.mxu1 %v1284_v36 }
  0x11   : > { %1176 = vmatprep.mubr.msk.f32.mxu0 %vm313_vm0, %v282_v16  ;;  %1271 = vmatpush3.bf16.msra.mxu0 %v1268_v13  ;;  %v285_v21 = vld [vmem:[%s1400_s10 + $0x18] sm:$0xff]  ;;  %v286_v22 = vld [vmem:[%s1400_s10 + $0x20] sm:$0xff]  ;;  %v287_v23 = vld [vmem:[%s1400_s10 + $0x28] sm:$0xff] }
  0x12   : > { %1273 = vmatprep.subr.bf16.mxu0 %v1272_v18  ;;  %v288_v24 = vld [vmem:[%s1400_s10 + $0x30] sm:$0xff]  ;;  %v289_v25 = vld [vmem:[%s1400_s10 + $0x38] sm:$0xff]  ;;  %v290_v26 = vld [vmem:[%s1400_s10 + $0x40] sm:$0xff] }
  0x13   : > { %v291_v27 = vld [vmem:[%s1400_s10 + $0x48] sm:$0xff]  ;;  %v292_v28 = vld [vmem:[%s1400_s10 + $0x50] sm:$0xff]  ;;  %v293_v29 = vld [vmem:[%s1400_s10 + $0x58] sm:$0xff] }
  0x14   : > { %v294_v30 = vld [vmem:[%s1400_s10 + $0x60] sm:$0xff]  ;;  %v295_v31 = vld [vmem:[%s1400_s10 + $0x68] sm:$0xff]  ;;  %v296_v32 = vld [vmem:[%s1400_s10 + $0x70] sm:$0xff] }
  0x15   : > { %1275 = vmatpush3.bf16.msra.mxu0 %v1272_v18  ;;  %v297_v33 = vld [vmem:[%s1400_s10 + $0x78] sm:$0xff] }
  0x16   : > { %1277 = vmatprep.subr.bf16.mxu0 %v1276_v10 }
  0x18   : > { %1177 = vmatmul.mubr.msk.f32.vlgmr.msra.gmra.mrb[0].mxu0 %vm313_vm0, %v283_v19 }
  0x19   : > { %1179 = vmatprep.mubr.msk.f32.mxu0 %vm313_vm0, %v284_v20  ;;  %1279 = vmatpush3.bf16.msra.mxu0 %v1276_v10 }
  0x1a   : > { %1281 = vmatprep.subr.bf16.mxu0 %v1280_v17 }
  0x1c   : > { %1180 = vmatmul.mubr.msk.f32.gmra.mrb[2].mxu0 %vm313_vm0, %v285_v21 }
  0x1d   : > { %1182 = vmatprep.mubr.msk.f32.mxu0 %vm313_vm0, %v286_v22  ;;  %1283 = vmatpush3.bf16.msra.mxu0 %v1280_v17  ;;  %v1062_v22 = vld [vmem:[%s1527_s4] ss:$0 sm:$0xff] }
  0x20   : > { %1183 = vmatmul.mubr.msk.f32.gmra.mrb[4].mxu0 %vm313_vm0, %v287_v23 }
  0x21   : > { %1185 = vmatprep.mubr.msk.f32.mxu0 %vm313_vm0, %v288_v24 }
  0x24   : > { %1186 = vmatmul.mubr.msk.f32.gmra.mrb[6].mxu0 %vm313_vm0, %v289_v25 }
  0x25   : > { %1188 = vmatprep.mubr.msk.f32.mxu0 %vm313_vm0, %v290_v26 }
  0x28   : > { %1189 = vmatmul.mubr.msk.f32.gmra.mrb[8].mxu0 %vm313_vm0, %v291_v27 }
  0x29   : > { %1191 = vmatprep.mubr.msk.f32.mxu0 %vm313_vm0, %v292_v28 }
  0x2c   : > { %1192 = vmatmul.mubr.msk.f32.gmra.mrb[10].mxu0 %vm313_vm0, %v293_v29 }
  0x2d   : > { %1194 = vmatprep.mubr.msk.f32.mxu0 %vm313_vm0, %v294_v30 }
  0x30   : > { %1195 = vmatmul.mubr.msk.f32.gmra.mrb[12].mxu0 %vm313_vm0, %v295_v31 }
  0x31   : > { %1197 = vmatprep.mubr.msk.f32.mxu0 %vm313_vm0, %v296_v32 }
  0x34   : > { %1198 = vmatmul.mubr.msk.f32.gmra.mrb[14].mxu0 %vm313_vm0, %v297_v33 }
  0xeb   : > { %v1178_v38 = vpop.f32.mrb[0].mxu0 }
  0xec   : > { %v434_v39 = vadd.f32 %v1178_v38, %v1045_v37  ;;  %v428_v40 = vpop.f32.mrb[1].mxu0 }
  0xed   : > { %v429_v41 = vadd.f32 %v1045_v37, %v428_v40 }
  0xee   : > { %v508_v44 = vmax.f32 %v434_v39, 0.0 }
  0xef   : > { %v507_v42 = vmax.f32 %v429_v41, 0.0  ;;  %v1181_v43 = vpop.f32.mrb[2].mxu0 }
  0xf0   : > { %v444_v45 = vadd.f32 %v1181_v43, %v1045_v37  ;;  %v438_v46 = vpop.f32.mrb[3].mxu0 }
  0xf1   : > { %v439_v47 = vadd.f32 %v1045_v37, %v438_v46  ;;  %1208 = vmatprep.mubr.msk.f32.mxu0 %vm534_vm1, %v507_v42 }
  0xf2   : > { %1209 = vmatmul.mubr.msk.f32.vlgmr.msra.gmra.mrb[16].mxu0 %vm534_vm1, %v508_v44  ;;  %v510_v50 = vmax.f32 %v444_v45, 0.0 }
  0xf3   : > { %v509_v48 = vmax.f32 %v439_v47, 0.0  ;;  %v1184_v49 = vpop.f32.mrb[4].mxu0 }
  0xf4   : > { %v454_v51 = vadd.f32 %v1184_v49, %v1045_v37  ;;  %v448_v52 = vpop.f32.mrb[5].mxu0 }
  0xf5   : > { %v449_v53 = vadd.f32 %v1045_v37, %v448_v52  ;;  %1211 = vmatprep.mubr.msk.f32.mxu0 %vm534_vm1, %v509_v48 }
  0xf6   : > { %1212 = vmatmul.mubr.msk.f32.gmra.mrb[18].mxu0 %vm534_vm1, %v510_v50  ;;  %v512_v56 = vmax.f32 %v454_v51, 0.0 }
  0xf7   : > { %v511_v54 = vmax.f32 %v449_v53, 0.0  ;;  %v1187_v55 = vpop.f32.mrb[6].mxu0 }
  0xf8   : > { %v464_v57 = vadd.f32 %v1187_v55, %v1045_v37  ;;  %v458_v58 = vpop.f32.mrb[7].mxu0 }
  0xf9   : > { %v459_v59 = vadd.f32 %v1045_v37, %v458_v58  ;;  %1214 = vmatprep.mubr.msk.f32.mxu0 %vm534_vm1, %v511_v54 }
  0xfa   : > { %1215 = vmatmul.mubr.msk.f32.gmra.mrb[20].mxu0 %vm534_vm1, %v512_v56  ;;  %v514_v62 = vmax.f32 %v464_v57, 0.0 }
  0xfb   : > { %v513_v60 = vmax.f32 %v459_v59, 0.0  ;;  %v1190_v61 = vpop.f32.mrb[8].mxu0 }
  0xfc   : > { %v474_v63 = vadd.f32 %v1190_v61, %v1045_v37  ;;  %v468_v0 = vpop.f32.mrb[9].mxu0 }
  0xfd   : > { %v469_v1 = vadd.f32 %v1045_v37, %v468_v0  ;;  %1217 = vmatprep.mubr.msk.f32.mxu1 %vm534_vm1, %v513_v60 }
  0xfe   : > { %1218 = vmatmul.mubr.msk.f32.vlgmr.msra.gmra.mrb[0].mxu1 %vm534_vm1, %v514_v62  ;;  %v516_v4 = vmax.f32 %v474_v63, 0.0 }
  0xff   : > { %v515_v2 = vmax.f32 %v469_v1, 0.0  ;;  %v1193_v3 = vpop.f32.mrb[10].mxu0  ;;  %1287 = vmatpush3.bf16.msra.mxu1 %v1284_v36 }
 0x100   : > { %v484_v5 = vadd.f32 %v1193_v3, %v1045_v37  ;;  %v478_v6 = vpop.f32.mrb[11].mxu0 }
 0x101   : > { %v479_v7 = vadd.f32 %v1045_v37, %v478_v6  ;;  %1220 = vmatprep.mubr.msk.f32.mxu1 %vm534_vm1, %v515_v2 }
 0x102   : > { %1221 = vmatmul.mubr.msk.f32.gmra.mrb[2].mxu1 %vm534_vm1, %v516_v4  ;;  %v518_v10 = vmax.f32 %v484_v5, 0.0 }
 0x103   : > { %v517_v8 = vmax.f32 %v479_v7, 0.0  ;;  %v1196_v9 = vpop.f32.mrb[12].mxu0  ;;  %v1079_v7 = vld [vmem:[%s1529_s6] ss:$0 sm:$0xff] }
 0x104   : > { %v494_v11 = vadd.f32 %v1196_v9, %v1045_v37  ;;  %v488_v12 = vpop.f32.mrb[13].mxu0 }
 0x105   : > { %v489_v13 = vadd.f32 %v1045_v37, %v488_v12  ;;  %1223 = vmatprep.mubr.msk.f32.mxu1 %vm534_vm1, %v517_v8 }
 0x106   : > { %1224 = vmatmul.mubr.msk.f32.gmra.mrb[4].mxu1 %vm534_vm1, %v518_v10  ;;  %v520_v16 = vmax.f32 %v494_v11, 0.0 }
 0x107   : > { %v519_v14 = vmax.f32 %v489_v13, 0.0  ;;  %v1199_v15 = vpop.f32.mrb[14].mxu0 }
 0x108   : > { %v504_v17 = vadd.f32 %v1199_v15, %v1045_v37  ;;  %v498_v18 = vpop.f32.mrb[15].mxu0 }
 0x109   : > { %v499_v19 = vadd.f32 %v1045_v37, %v498_v18  ;;  %1226 = vmatprep.mubr.msk.f32.mxu1 %vm534_vm1, %v519_v14 }
 0x10a   : > { %1227 = vmatmul.mubr.msk.f32.gmra.mrb[6].mxu1 %vm534_vm1, %v520_v16  ;;  %v522_v21 = vmax.f32 %v504_v17, 0.0 }
 0x10b   : > { %v521_v20 = vmax.f32 %v499_v19, 0.0 }
 0x10d   : > { %1229 = vmatprep.mubr.msk.f32.mxu1 %vm534_vm1, %v521_v20 }
 0x10e   : > { %1230 = vmatmul.mubr.msk.f32.gmra.mrb[8].mxu1 %vm534_vm1, %v522_v21 }
 0x1c5   : > { %v1210_v23 = vpop.f32.mrb[16].mxu0 }
 0x1c6   : > { %v655_v24 = vadd.f32 %v1210_v23, %v1062_v22  ;;  %v649_v25 = vpop.f32.mrb[17].mxu0 }
 0x1c7   : > { %v650_v26 = vadd.f32 %v1062_v22, %v649_v25 }
 0x1c8   : > { %v729_v29 = vmax.f32 %v655_v24, 0.0 }
 0x1c9   : > { %v728_v27 = vmax.f32 %v650_v26, 0.0  ;;  %v1213_v28 = vpop.f32.mrb[18].mxu0 }
 0x1ca   : > { %v665_v30 = vadd.f32 %v1213_v28, %v1062_v22  ;;  %v659_v31 = vpop.f32.mrb[19].mxu0 }
 0x1cb   : > { %v660_v32 = vadd.f32 %v1062_v22, %v659_v31  ;;  %1236 = vmatprep.mubr.msk.f32.mxu1 %vm753_vm2, %v728_v27 }
 0x1cc   : > { %1237 = vmatmul.mubr.msk.f32.vlgmr.msra.gmra.mrb[10].mxu1 %vm753_vm2, %v729_v29  ;;  %v731_v35 = vmax.f32 %v665_v30, 0.0 }
 0x1cd   : > { %v730_v33 = vmax.f32 %v660_v32, 0.0  ;;  %v1216_v34 = vpop.f32.mrb[20].mxu0 }
 0x1ce   : > { %v675_v36 = vadd.f32 %v1216_v34, %v1062_v22  ;;  %v669_v37 = vpop.f32.mrb[21].mxu0 }
 0x1cf   : > { %v670_v38 = vadd.f32 %v1062_v22, %v669_v37  ;;  %1239 = vmatprep.mubr.msk.f32.mxu1 %vm753_vm2, %v730_v33 }
 0x1d0   : > { %1240 = vmatmul.mubr.msk.f32.gmra.mrb[12].mxu1 %vm753_vm2, %v731_v35  ;;  %v733_v41 = vmax.f32 %v675_v36, 0.0 }
 0x1d1   : > { %v732_v39 = vmax.f32 %v670_v38, 0.0  ;;  %v1219_v40 = vpop.f32.mrb[0].mxu1 }
 0x1d2   : > { %v685_v42 = vadd.f32 %v1219_v40, %v1062_v22  ;;  %v679_v43 = vpop.f32.mrb[1].mxu1 }
 0x1d3   : > { %v680_v44 = vadd.f32 %v1062_v22, %v679_v43  ;;  %1242 = vmatprep.mubr.msk.f32.mxu1 %vm753_vm2, %v732_v39 }
 0x1d4   : > { %1243 = vmatmul.mubr.msk.f32.gmra.mrb[14].mxu1 %vm753_vm2, %v733_v41  ;;  %v735_v47 = vmax.f32 %v685_v42, 0.0 }
 0x1d5   : > { %v734_v45 = vmax.f32 %v680_v44, 0.0  ;;  %v1222_v46 = vpop.f32.mrb[2].mxu1 }
 0x1d6   : > { %v695_v48 = vadd.f32 %v1222_v46, %v1062_v22  ;;  %v689_v49 = vpop.f32.mrb[3].mxu1 }
 0x1d7   : > { %v690_v50 = vadd.f32 %v1062_v22, %v689_v49  ;;  %1245 = vmatprep.mubr.msk.f32.mxu1 %vm753_vm2, %v734_v45 }
 0x1d8   : > { %1246 = vmatmul.mubr.msk.f32.gmra.mrb[16].mxu1 %vm753_vm2, %v735_v47  ;;  %v737_v53 = vmax.f32 %v695_v48, 0.0 }
 0x1d9   : > { %v736_v51 = vmax.f32 %v690_v50, 0.0  ;;  %v1225_v52 = vpop.f32.mrb[4].mxu1 }
 0x1da   : > { %v705_v54 = vadd.f32 %v1225_v52, %v1062_v22  ;;  %v699_v55 = vpop.f32.mrb[5].mxu1 }
 0x1db   : > { %v700_v56 = vadd.f32 %v1062_v22, %v699_v55  ;;  %1248 = vmatprep.mubr.msk.f32.mxu1 %vm753_vm2, %v736_v51 }
 0x1dc   : > { %1249 = vmatmul.mubr.msk.f32.gmra.mrb[18].mxu1 %vm753_vm2, %v737_v53  ;;  %v739_v59 = vmax.f32 %v705_v54, 0.0 }
 0x1dd   : > { %v738_v57 = vmax.f32 %v700_v56, 0.0  ;;  %v1228_v58 = vpop.f32.mrb[6].mxu1 }
 0x1de   : > { %v715_v60 = vadd.f32 %v1228_v58, %v1062_v22  ;;  %v709_v61 = vpop.f32.mrb[7].mxu1 }
 0x1df   : > { %v710_v62 = vadd.f32 %v1062_v22, %v709_v61  ;;  %1251 = vmatprep.mubr.msk.f32.mxu1 %vm753_vm2, %v738_v57 }
 0x1e0   : > { %1252 = vmatmul.mubr.msk.f32.gmra.mrb[20].mxu1 %vm753_vm2, %v739_v59  ;;  %v741_v1 = vmax.f32 %v715_v60, 0.0 }
 0x1e1   : > { %v740_v63 = vmax.f32 %v710_v62, 0.0  ;;  %v1231_v0 = vpop.f32.mrb[8].mxu1 }
 0x1e2   : > { %v725_v2 = vadd.f32 %v1231_v0, %v1062_v22  ;;  %v719_v3 = vpop.f32.mrb[9].mxu1 }
 0x1e3   : > { %v720_v4 = vadd.f32 %v1062_v22, %v719_v3  ;;  %1254 = vmatprep.mubr.msk.f32.mxu1 %vm753_vm2, %v740_v63 }
 0x1e4   : > { %1255 = vmatmul.mubr.msk.f32.gmra.mrb[22].mxu1 %vm753_vm2, %v741_v1  ;;  %v743_v6 = vmax.f32 %v725_v2, 0.0 }
 0x1e5   : > { %v742_v5 = vmax.f32 %v720_v4, 0.0 }
 0x1e7   : > { %1257 = vmatprep.mubr.msk.f32.mxu1 %vm753_vm2, %v742_v5 }
 0x1e8   : > { %1258 = vmatmul.mubr.msk.f32.gmra.mrb[24].mxu1 %vm753_vm2, %v743_v6 }
 0x29f   : > { %v1238_v8 = vpop.f32.mrb[10].mxu1 }
 0x2a0   : > { %v874_v9 = vadd.f32 %v1238_v8, %v1079_v7  ;;  %v868_v10 = vpop.f32.mrb[11].mxu1 }
 0x2a1   : > { %v869_v11 = vadd.f32 %v1079_v7, %v868_v10 }
 0x2a2   : > { %v948_v12 = vmax.f32 %v874_v9, 0.0 }
 0x2a3   : > { %v947_v13 = vmax.f32 %v869_v11, 0.0  ;;  %v1241_v14 = vpop.f32.mrb[12].mxu1 }
 0x2a4   : > { %965 = vst.msk [vmem:[%s1486_s23 + $0x8] sm:$0xff] %vm963_vm3, %v948_v12  ;;  %v884_v15 = vadd.f32 %v1241_v14, %v1079_v7  ;;  %v878_v16 = vpop.f32.mrb[13].mxu1 }
 0x2a5   : > { %964 = vst.msk [vmem:[%s1486_s23] sm:$0xff] %vm963_vm3, %v947_v13  ;;  %v879_v17 = vadd.f32 %v1079_v7, %v878_v16 }
 0x2a6   : > { %v950_v18 = vmax.f32 %v884_v15, 0.0 }
 0x2a7   : > { %v949_v19 = vmax.f32 %v879_v17, 0.0  ;;  %v1244_v20 = vpop.f32.mrb[14].mxu1 }
 0x2a8   : > { %967 = vst.msk [vmem:[%s1486_s23 + $0x18] sm:$0xff] %vm963_vm3, %v950_v18  ;;  %v894_v21 = vadd.f32 %v1244_v20, %v1079_v7  ;;  %v888_v22 = vpop.f32.mrb[15].mxu1 }
 0x2a9   : > { %966 = vst.msk [vmem:[%s1486_s23 + $0x10] sm:$0xff] %vm963_vm3, %v949_v19  ;;  %v889_v23 = vadd.f32 %v1079_v7, %v888_v22 }
 0x2aa   : > { %v952_v24 = vmax.f32 %v894_v21, 0.0 }
 0x2ab   : > { %v951_v25 = vmax.f32 %v889_v23, 0.0  ;;  %v1247_v26 = vpop.f32.mrb[16].mxu1 }
 0x2ac   : > { %969 = vst.msk [vmem:[%s1486_s23 + $0x28] sm:$0xff] %vm963_vm3, %v952_v24  ;;  %v904_v27 = vadd.f32 %v1247_v26, %v1079_v7  ;;  %v898_v28 = vpop.f32.mrb[17].mxu1 }
 0x2ad   : > { %968 = vst.msk [vmem:[%s1486_s23 + $0x20] sm:$0xff] %vm963_vm3, %v951_v25  ;;  %v899_v29 = vadd.f32 %v1079_v7, %v898_v28 }
 0x2ae   : > { %v954_v30 = vmax.f32 %v904_v27, 0.0 }
 0x2af   : > { %v953_v31 = vmax.f32 %v899_v29, 0.0  ;;  %v1250_v32 = vpop.f32.mrb[18].mxu1 }
 0x2b0   : > { %971 = vst.msk [vmem:[%s1486_s23 + $0x38] sm:$0xff] %vm963_vm3, %v954_v30  ;;  %v914_v33 = vadd.f32 %v1250_v32, %v1079_v7  ;;  %v908_v34 = vpop.f32.mrb[19].mxu1 }
 0x2b1   : > { %970 = vst.msk [vmem:[%s1486_s23 + $0x30] sm:$0xff] %vm963_vm3, %v953_v31  ;;  %v909_v35 = vadd.f32 %v1079_v7, %v908_v34 }
 0x2b2   : > { %v956_v36 = vmax.f32 %v914_v33, 0.0 }
 0x2b3   : > { %v955_v37 = vmax.f32 %v909_v35, 0.0  ;;  %v1253_v38 = vpop.f32.mrb[20].mxu1 }
 0x2b4   : > { %973 = vst.msk [vmem:[%s1486_s23 + $0x48] sm:$0xff] %vm963_vm3, %v956_v36  ;;  %v924_v39 = vadd.f32 %v1253_v38, %v1079_v7  ;;  %v918_v40 = vpop.f32.mrb[21].mxu1 }
 0x2b5   : > { %972 = vst.msk [vmem:[%s1486_s23 + $0x40] sm:$0xff] %vm963_vm3, %v955_v37  ;;  %v919_v41 = vadd.f32 %v1079_v7, %v918_v40 }
 0x2b6   : > { %v958_v42 = vmax.f32 %v924_v39, 0.0 }
 0x2b7   : > { %v957_v43 = vmax.f32 %v919_v41, 0.0  ;;  %v1256_v44 = vpop.f32.mrb[22].mxu1 }
 0x2b8   : > { %975 = vst.msk [vmem:[%s1486_s23 + $0x58] sm:$0xff] %vm963_vm3, %v958_v42  ;;  %v934_v45 = vadd.f32 %v1256_v44, %v1079_v7  ;;  %v928_v46 = vpop.f32.mrb[23].mxu1 }
 0x2b9   : > { %974 = vst.msk [vmem:[%s1486_s23 + $0x50] sm:$0xff] %vm963_vm3, %v957_v43  ;;  %v929_v47 = vadd.f32 %v1079_v7, %v928_v46 }
 0x2ba   : > { %v960_v48 = vmax.f32 %v934_v45, 0.0 }
 0x2bb   : > { %v959_v49 = vmax.f32 %v929_v47, 0.0  ;;  %v1259_v50 = vpop.f32.mrb[24].mxu1 }
 0x2bc   : > { %977 = vst.msk [vmem:[%s1486_s23 + $0x68] sm:$0xff] %vm963_vm3, %v960_v48  ;;  %v944_v51 = vadd.f32 %v1259_v50, %v1079_v7  ;;  %v938_v52 = vpop.f32.mrb[25].mxu1 }
 0x2bd   : > { %976 = vst.msk [vmem:[%s1486_s23 + $0x60] sm:$0xff] %vm963_vm3, %v959_v49  ;;  %v939_v53 = vadd.f32 %v1079_v7, %v938_v52 }
 0x2be   : > { %v962_v54 = vmax.f32 %v944_v51, 0.0 }
 0x2bf   : > { %v961_v55 = vmax.f32 %v939_v53, 0.0 }
 0x2c0   : > { %979 = vst.msk [vmem:[%s1486_s23 + $0x78] sm:$0xff] %vm963_vm3, %v962_v54 }
 0x2c1   : > { %978 = vst.msk [vmem:[%s1486_s23 + $0x70] sm:$0xff] %vm963_vm3, %v961_v55 }
 0x2c2 PF: > { %s17_s24 = sadd.s32 1, %s1306_s24  }
 0x2c3   : > { %p14_p4 = scmp.ge.s32.totalorder %s17_s24, 6  }
 0x2c5   :  { %16 = sbr.rel (!%p14_p4) target bundleno = 1 (0x1), region = 78 }

</bundles_post_ra>
